<compile_context>
chip_gen: v7x
topology: tpu7x:2x2x1
jax: 0.10.0
libtpu: 0.0.40
codegen_flags: <defaults>
</compile_context>

<pallas_src>
import functools

import jax
import jax.numpy as jnp
from jax.experimental import pallas as pl
from jax.experimental.pallas import tpu as pltpu


def _round_up(x, n):
    return ((x + n - 1) // n) * n


def _cosface_kernel(logits_ref, labels_ref, out_ref, *, s, m, bc):
    # logits_ref: (bn, bc) ; labels_ref: (bn, 1) ; out_ref: (bn, bc)
    j = pl.program_id(1)
    bn = logits_ref.shape[0]

    # Shift the per-row label by this tile's column offset (bn ops) rather than
    # adding j*bc to every element's column iota (bn*bc ops).
    lab_local = labels_ref[...] - j * bc                        # (bn, 1) int32
    col = jax.lax.broadcasted_iota(jnp.int32, (bn, bc), 1)      # local col idx

    # labels == -1 can never equal a non-negative column index, so no explicit
    # "ignore" mask is needed. Padded ragged columns are >= C globally and can
    # likewise never match a real label; padded rows are masked on writeback.
    hit = (col == lab_local)

    # Compute in f32 (free: kernel is memory-bound), cast back at the store.
    x = logits_ref[...].astype(jnp.float32)
    out = s * x - (s * m) * hit.astype(jnp.float32)             # == s*(x - m*hit)
    out_ref[...] = out.astype(out_ref.dtype)


def _tile_budget():
    """Generation-aware (target_tile_bytes, vmem_limit_bytes)."""
    try:
        vmem_phys = pltpu.get_tpu_info().vmem_capacity_bytes
    except Exception:
        vmem_phys = None
    if vmem_phys is not None and vmem_phys <= 96 * 1024 * 1024:
        # v7x-class: 64 MiB physical VMEM, ~3.2 TB/s HBM. 6 MiB tiles amortize
        # the ~0.35 us/step overhead; double-buffered in+out ~= 24 MiB, so
        # raise the scoped limit to 40 MiB.
        return 6 * 1024 * 1024, 40 << 20
    # v5e / v6e class (128 MiB physical): 4 MiB tiles -> ~16-17 MiB pipelined.
    # A 32 MiB scoped limit also covers v5e's 16 MiB default without risk.
    return 4 * 1024 * 1024, 32 << 20


def cosface(logits, labels, *, s=64.0, m=0.4):
    """Applies the CosFace margin + scale to `logits` given integer `labels`.

    labels[i] == -1 means "no margin for this row".
    """
    N, C = logits.shape
    itemsize = jnp.dtype(logits.dtype).itemsize
    target_tile_bytes, vmem_limit = _tile_budget()

    # Minimum sublane quantum for the storage dtype (f32: 8, bf16: 16, i8: 32).
    sublane = {4: 8, 2: 16, 1: 32}.get(itemsize, 8)

    # Column tile: lane-dense multiple of 128, capped at 2048. Never take a
    # huge full-extent C; Pallas masks ragged edge blocks.
    bc = min(_round_up(C, 128), 2048)

    # Row tile: aim for ~target_tile_bytes per logits tile, sublane multiple.
    rows = max(sublane, target_tile_bytes // (bc * itemsize))
    bn = min((rows // sublane) * sublane, _round_up(N, sublane))
    bn = max(bn, sublane)

    grid_rows = pl.cdiv(N, bn)
    grid_cols = pl.cdiv(C, bc)

    # Keep both v7x TensorCores and the DMA pipeline busy: if the grid is very
    # coarse, shrink the row tile (work permitting) to reach >= ~8 total steps.
    while grid_rows * grid_cols < 8 and bn > sublane:
        new_bn = max(sublane, ((bn // 2) // sublane) * sublane)
        if new_bn == bn:
            break
        bn = new_bn
        grid_rows = pl.cdiv(N, bn)

    labels2d = labels.reshape(N, 1).astype(jnp.int32)
    kernel = functools.partial(_cosface_kernel, s=float(s), m=float(m), bc=bc)

    # Column axis innermost: the (bn, 1) labels block (index_map -> (i, 0))
    # stays resident across the inner loop and is only re-fetched per row tile.
    grid = (grid_rows, grid_cols)

    return pl.pallas_call(
        kernel,
        out_shape=jax.ShapeDtypeStruct((N, C), logits.dtype),
        grid_spec=pltpu.PrefetchScalarGridSpec(
            num_scalar_prefetch=0,
            grid=grid,
            in_specs=[
                pl.BlockSpec((bn, bc), lambda i, j: (i, j)),
                pl.BlockSpec((bn, 1), lambda i, j: (i, 0)),
            ],
            out_specs=pl.BlockSpec((bn, bc), lambda i, j: (i, j)),
        ),
        # Each logits block is read before its writeback and in/out specs are
        # identical -> in-place update is safe; halves HBM footprint and avoids
        # an XLA copy when the caller donates logits.
        input_output_aliases={0: 0},
        cost_estimate=pl.CostEstimate(
            flops=3 * N * C,
            transcendentals=0,
            bytes_accessed=2 * N * C * itemsize + N * 4),
        compiler_params=pltpu.CompilerParams(
            dimension_semantics=("parallel", "parallel"),
            vmem_limit_bytes=vmem_limit),
    )(logits, labels2d)


def cosface_ref(logits, labels, *, s=64.0, m=0.4):
    # Pure-JAX reference of the PyTorch forward.
    N, C = logits.shape
    col = jnp.arange(C)[None, :]
    lab = labels[:, None]
    hit = jnp.logical_and(lab != -1, col == lab)
    return s * (logits - m * hit.astype(logits.dtype))


if __name__ == "__main__":
    key = jax.random.PRNGKey(0)

    # Case 1: aligned small shapes.
    k1, k2, k3, k4 = jax.random.split(key, 4)
    N, C = 8, 256
    logits = jax.random.normal(k1, (N, C), dtype=jnp.float32)
    labels = jax.random.randint(k2, (N,), 0, C, dtype=jnp.int32)
    labels = labels.at[1].set(-1).at[5].set(-1)          # "ignore" rows
    ref = cosface_ref(logits, labels)
    out = cosface(logits, labels)
    jax.block_until_ready(out)
    assert jnp.allclose(out, ref, atol=1e-5, rtol=1e-5), "mismatch (aligned case)"

    # Case 2: ragged shapes (exercise masked edge blocks, no full-extent tiles).
    N2, C2 = 10, 200
    logits2 = jax.random.normal(k3, (N2, C2), dtype=jnp.float32)
    labels2 = jax.random.randint(k4, (N2,), 0, C2, dtype=jnp.int32)
    labels2 = labels2.at[0].set(-1)
    ref2 = cosface_ref(logits2, labels2)
    out2 = cosface(logits2, labels2)
    jax.block_until_ready(out2)
    assert jnp.allclose(out2, ref2, atol=1e-5, rtol=1e-5), "mismatch (ragged case)"

    print("KERNEL_OK")
</pallas_src>

<mosaic_0001>
module attributes {stable_mosaic.version = 11 : i64} {
  func.func @_cosface_kernel(%arg0: i32, %arg1: i32, %arg2: memref<8x256xf32, #tpu.memory_space<vmem>>, %arg3: memref<8x1xi32, #tpu.memory_space<vmem>>, %arg4: memref<8x256xf32, #tpu.memory_space<vmem>>) attributes {dimension_semantics = [#tpu.dimension_semantics<parallel>, #tpu.dimension_semantics<parallel>], iteration_bounds = array<i64: 1, 1>, scalar_prefetch = 0 : i64, scratch_operands = 0 : i64, tpu.core_type = #tpu.core_type<tc>, window_params = [{transform_indices = @transform_0, window_bounds = array<i64: 8, 256>}, {transform_indices = @transform_1, window_bounds = array<i64: 8, 1>}, {transform_indices = @transform_2, window_bounds = array<i64: 8, 256>}]} {
    %c0 = arith.constant 0 : index
    %c0_0 = arith.constant 0 : index
    %0 = vector.load %arg3[%c0, %c0_0] : memref<8x1xi32, #tpu.memory_space<vmem>>, vector<8x1xi32>
    %c256_i32 = arith.constant 256 : i32
    %1 = arith.muli %arg1, %c256_i32 : i32
    %2 = vector.broadcast %1 : i32 to vector<8x1xi32>
    %3 = arith.subi %0, %2 : vector<8x1xi32>
    %4 = tpu.iota {dimensions = array<i32: 1>} : vector<8x256xi32>
    %5 = vector.broadcast %3 : vector<8x1xi32> to vector<8x256xi32>
    %6 = arith.cmpi eq, %4, %5 : vector<8x256xi32>
    %c0_1 = arith.constant 0 : index
    %c0_2 = arith.constant 0 : index
    %7 = vector.load %arg2[%c0_1, %c0_2] : memref<8x256xf32, #tpu.memory_space<vmem>>, vector<8x256xf32>
    %cst = arith.constant 6.400000e+01 : f32
    %8 = vector.broadcast %cst : f32 to vector<8x256xf32>
    %9 = arith.mulf %8, %7 : vector<8x256xf32>
    %10 = arith.extui %6 : vector<8x256xi1> to vector<8x256xi32>
    %11 = arith.sitofp %10 : vector<8x256xi32> to vector<8x256xf32>
    %cst_3 = arith.constant 2.560000e+01 : f32
    %12 = vector.broadcast %cst_3 : f32 to vector<8x256xf32>
    %13 = arith.mulf %12, %11 : vector<8x256xf32>
    %14 = arith.subf %9, %13 : vector<8x256xf32>
    %c0_4 = arith.constant 0 : index
    %c0_5 = arith.constant 0 : index
    %15 = vector.load %arg4[%c0_4, %c0_5] : memref<8x256xf32, #tpu.memory_space<vmem>>, vector<8x256xf32>
    tpu.vector_store %arg4[%c0_4, %c0_5], %14 {strides = array<i32>} : memref<8x256xf32, #tpu.memory_space<vmem>>, vector<8x256xf32>,
    return
  }
  func.func @transform_0(%arg0: i32, %arg1: i32) -> (i32, i32) {
    %c0_i32 = arith.constant 0 : i32
    return %arg0, %arg1 : i32, i32
  }
  func.func @transform_1(%arg0: i32, %arg1: i32) -> (i32, i32) {
    %c0_i32 = arith.constant 0 : i32
    %c0_i32_0 = arith.constant 0 : i32
    return %arg0, %c0_i32 : i32, i32
  }
  func.func @transform_2(%arg0: i32, %arg1: i32) -> (i32, i32) {
    %c0_i32 = arith.constant 0 : i32
    return %arg0, %arg1 : i32, i32
  }
}

</mosaic_0001>

<bundles_post_ra>
// kernel: tpu_custom_call.1
= control target key start
LH: loop header
LB: loop body
LE: loop exit
PB: predicated region body
PF: predicated region fallthrough
CT: control target
= control target key end

     0   :  { %7 = vsyncpa [#allocation3], 0  ;;  %s166_s0 = inlined_call_operand.hbm [shape: f32[8,256], index: 0, kind: input, shape index: {}, may-alias: {0,2}]   ;;  %s167_s1 = inlined_call_operand.vmem [shape: s32[8,1], index: 1, kind: input, shape index: {}]   ;;  %s168_s2 = inlined_call_operand.hbm [shape: f32[8,256], index: 2, kind: output, shape index: {}, may-alias: {0,2}]  }
   0x1   :  { %8 = vsyncpa [#allocation4], 0  ;;  %s120_s9 = smov [#allocation2]   ;;  %s72_s13 = scalar_lea.hbm %s166_s0, 256 }
   0x2   :  { %s15_s10 = sshll.u32 %s120_s9, 4  ;;  %p73_p0 = scmp.ne.s32.totalorder %s166_s0, %s72_s13  ;;  %s16_s10 = int_to_ptr.vmem [resolvable:$true] %s15_s10 }
   0x3   :  { %p76_p1 = scmp.lt.u32.totalorder %s72_s13, %s166_s0 }
   0x5   :  { %p78_p2 = pnand %p76_p1, %p73_p0 }
   0x7   :  { %81 = shalt.err (!%p78_p2)
}
   0x8   :  { %s82_s18 = scalar_lea.vmem %s16_s10, 256  ;;  %p87_p4 = scmp.lt.s32.totalorder %s16_s10, %s16_s10 }
   0x9   :  { %p83_p3 = scmp.ne.s32.totalorder %s16_s10, %s82_s18  ;;  %p88_p5 = scmp.lt.s32.totalorder %s82_s18, %s82_s18 }
   0xb   :  { %p89_p6 = por %p88_p5, %p87_p4 }
   0xd   :  { %p90_p7 = pnand %p89_p6, %p83_p3 }
   0xf   :  { %93 = shalt.err (!%p90_p7)
}
  0x10   :  { %18 = dma.hbm_to_vmem [thread:$0]  %s166_s0, 256, %s16_s10, [#allocation3]  }
  0x11   :  { %116 = dma.done.wait [#allocation3], 256  }
  0x12   :  { %117 = vsyncadd [#allocation3], 4294967040  ;;  %v121_v0 = vmov 0   ;;  %v24_v1 = vld [vmem:[%s167_s1] sm:$0xff]  ;;  %v28_v2 = vlaneseq  ;;  %v37_v6 = vld [vmem:[#allocation2 + $0x8] sm:$0xff]  ;;  %v122_v10 = vmov 0.0  }
  0x13   :  { %71 = vset.pattern.permute.xlu0 %v121_v0  ;;  %v36_v5 = vld [vmem:[#allocation2] sm:$0xff]  ;;  %v39_v9 = vmul.f32 64.0, %v37_v6  ;;  %s123_s0 = smov [#allocation5]  }
  0x14   :  { %32 = vperm.xlu0 %71, %v24_v1   ;;  %v29_v3 = vand.u32 127, %v28_v2  ;;  %v38_v8 = vmul.f32 64.0, %v36_v5  ;;  %s56_s23 = sshll.u32 %s123_s0, 4  ;;  %s57_s23 = int_to_ptr.vmem [resolvable:$true] %s56_s23 }
  0x15   :  { %s94_s1 = scalar_lea.vmem %s57_s23, 256  ;;  %p99_p9 = scmp.lt.s32.totalorder %s57_s23, %s57_s23 }
  0x16   :  { %v30_v4 = vadd.s32 128, %v29_v3  ;;  %p95_p8 = scmp.ne.s32.totalorder %s57_s23, %s94_s1  ;;  %p100_p10 = scmp.lt.s32.totalorder %s94_s1, %s94_s1 }
  0x18   :  { %p101_p11 = por %p100_p10, %p99_p9 }
  0x1a   :  { %p102_p12 = pnand %p101_p11, %p95_p8 }
  0x93   :  { %v33_v7 = vpop.permute.xlu0 %32 }
  0x94   :  { %vm34_vm0 = vcmp.eq.s32.totalorder %v29_v3, %v33_v7  ;;  %vm35_vm1 = vcmp.eq.s32.totalorder %v30_v4, %v33_v7 }
  0x95   :  { %v65_v11 = vsel %vm34_vm0, 1.0, %v122_v10  ;;  %v66_v12 = vsel %vm35_vm1, 1.0, %v122_v10 }
  0x96   :  { %v44_v13 = vmul.f32 25.6, %v65_v11  ;;  %v45_v14 = vmul.f32 25.6, %v66_v12 }
  0x98   :  { %v46_v15 = vsub.f32 %v38_v8, %v44_v13  ;;  %v47_v16 = vsub.f32 %v39_v9, %v45_v14 }
  0x9a   :  { %48 = vst [vmem:[#allocation5] sm:$0xff] %v46_v15  ;;  %49 = vst [vmem:[#allocation5 + $0x8] sm:$0xff] %v47_v16 }
  0x9b   :  { %105 = shalt.err (!%p102_p12)
}
  0x9c   :  { %s106_s26 = scalar_lea.hbm %s168_s2, 256 }
  0x9d   :  { %p107_p13 = scmp.ne.s32.totalorder %s168_s2, %s106_s26  ;;  %p110_p0 = scmp.lt.u32.totalorder %s106_s26, %s168_s2 }
  0x9f   :  { %p112_p1 = pnand %p110_p0, %p107_p13 }
  0xa1   :  { %115 = shalt.err (!%p112_p1)
}
  0xa2   :  { %59 = dma.vmem_to_hbm [thread:$0]  %s57_s23, 256, %s168_s2, [#allocation4]  }
  0xa3   :  { %118 = dma.done.wait [#allocation4], 256  }
  0xa4   :  { %119 = vsyncadd [#allocation4], 4294967040 }
  0xa5   :  { %63 = vsyncpa [#allocation3], 1 }
  0xa6   :  { %64 = vsyncpa [#allocation4], 1 }

</bundles_post_ra>
